<compile_context>
chip_gen: v6e
topology: v6e:2x2x1
jax: 0.10.0
libtpu: 0.0.40
codegen_flags: <defaults>
</compile_context>

<pallas_src>
import math

import jax
import jax.numpy as jnp
from jax.experimental import pallas as pl
from jax.experimental.pallas import tpu as pltpu

N_MIXES = 40
OUTPUT_DIMS = 4
HID = 16
EPS = 1e-5

HEAD_N = 2 * N_MIXES * OUTPUT_DIMS + N_MIXES        # 360  (mus | sigmas | pi)
HEAD_PAD = 384                                      # 3 x 128 -> lane-dense output stores
SIG_LO = N_MIXES * OUTPUT_DIMS                      # 160
SIG_HI = 2 * N_MIXES * OUTPUT_DIMS                  # 320

CAT_W = 64        # encoder LHS width: [h.. | x | 1 | zero-pad]
HEAD_K = 32       # head LHS width:    [h4 | 1 | zero-pad]


def _density_kernel(x_ref, vec_ref, wenc_ref, wh_ref, slope_ref, out_ref):
    """Whole batch resident per program; one program per head-column tile.

    vec_ref  : [10, 16]        rows: 0=w1, 1=b1, 2..5=gamma1..4, 6..9=beta1..4
    wenc_ref : [64, 48]        zero-padded encoder weights; cols [0:16|16:32|32:48]=enc2|3|4
                               (per-layer bias rides the constant-1 lane of the LHS)
    wh_ref   : [32, cols]      fused head weight block; row 16 carries the fused head bias
    slope_ref: [1, cols]       per-column LeakyReLU slope (0.1 on sigma cols, else 1.0)
    out_ref  : [B, cols]       lane-dense output slab
    """
    B = x_ref.shape[0]
    x = x_ref[...]                                   # [B, 1]
    ones = jnp.ones((B, 1), jnp.float32)

    def bn_relu(h, layer):
        # Training-mode BatchNorm1d + ReLU.  mean and E[h^2] come from ONE sublane
        # reduction (independent stats -> no serial reduce chain); gamma folded into scale.
        g = vec_ref[2 + layer:3 + layer, :]          # [1, 16] (ref slice -> free view)
        be = vec_ref[6 + layer:7 + layer, :]
        stats = jnp.mean(jnp.concatenate([h, h * h], axis=1), axis=0, keepdims=True)
        mean = stats[:, :HID]
        var = jnp.maximum(stats[:, HID:] - mean * mean, 0.0)
        scale = g * jax.lax.rsqrt(var + EPS)
        shift = be - mean * scale
        return jnp.maximum(h * scale + shift, 0.0)

    def pad_cat(parts, width):
        cur = sum(p.shape[1] for p in parts)
        if cur < width:
            parts = parts + [jnp.zeros((B, width - cur), jnp.float32)]
        return jnp.concatenate(parts, axis=1)

    # enc1: Linear(1 -> 16) is a broadcast scale + shift (no matmul needed).
    h1 = bn_relu(x * vec_ref[0:1, :] + vec_ref[1:2, :], 0)                       # [B,16]

    # enc2 on torch-order [h1, x]; bias rides the constant-1 lane.
    lhs2 = pad_cat([h1, x, ones], CAT_W)                                         # [B,64]
    h2 = bn_relu(jnp.dot(lhs2, wenc_ref[:, 0:HID],
                         preferred_element_type=jnp.float32), 1)                 # [B,16]

    # enc3 on [h2, h1, x]
    lhs3 = pad_cat([h2, h1, x, ones], CAT_W)
    h3 = bn_relu(jnp.dot(lhs3, wenc_ref[:, HID:2 * HID],
                         preferred_element_type=jnp.float32), 2)                 # [B,16]

    # enc4 on [h3, h2, h1, x]
    lhs4 = pad_cat([h3, h2, h1, x, ones], CAT_W)
    h4 = bn_relu(jnp.dot(lhs4, wenc_ref[:, 2 * HID:3 * HID],
                         preferred_element_type=jnp.float32), 3)                 # [B,16]

    # Fused MDN heads: one [B,32] @ [32,cols] matmul, bias folded into the 1-lane row.
    head_lhs = pad_cat([h4, ones], HEAD_K)                                       # [B,32]
    heads = jnp.dot(head_lhs, wh_ref[...], preferred_element_type=jnp.float32)
    slope = slope_ref[...]                                                       # [1,cols]
    out_ref[...] = jnp.where(heads < 0.0, heads * slope, heads)  # LeakyReLU on sigma cols only


def pack_params(p):
    """Fold the 22 small parameter tensors into 4 lane-/sublane-dense blocks (one-time)."""
    vec = jnp.concatenate(
        [p["w1"], p["b1"],
         p["g1"], p["g2"], p["g3"], p["g4"],
         p["be1"], p["be2"], p["be3"], p["be4"]], axis=0).astype(jnp.float32)    # [10,16]

    # Zero-padded encoder weights; each layer's LHS is [h.., x, 1, pad] (torch concat order).
    wenc = jnp.zeros((CAT_W, 3 * HID), jnp.float32)
    # enc2: LHS = [h1(0:16), x(16), 1(17)]
    wenc = wenc.at[0:16, 0:16].set(p["w2"][0:16])
    wenc = wenc.at[16:17, 0:16].set(p["w2"][16:17])
    wenc = wenc.at[17:18, 0:16].set(p["b2"])
    # enc3: LHS = [h2(0:16), h1(16:32), x(32), 1(33)]
    wenc = wenc.at[0:16, 16:32].set(p["w3"][0:16])
    wenc = wenc.at[16:32, 16:32].set(p["w3"][16:32])
    wenc = wenc.at[32:33, 16:32].set(p["w3"][32:33])
    wenc = wenc.at[33:34, 16:32].set(p["b3"])
    # enc4: LHS = [h3(0:16), h2(16:32), h1(32:48), x(48), 1(49)]
    wenc = wenc.at[0:48, 32:48].set(p["w4"][0:48])
    wenc = wenc.at[48:49, 32:48].set(p["w4"][48:49])
    wenc = wenc.at[49:50, 32:48].set(p["b4"])

    # Fused head, padded to 384 lanes; row 16 carries the fused bias (constant-1 lane).
    w_heads = jnp.zeros((HEAD_K, HEAD_PAD), jnp.float32)
    w_heads = w_heads.at[0:HID, 0:HEAD_N].set(
        jnp.concatenate([p["wmu"], p["wsig"], p["wpi"]], axis=1))
    w_heads = w_heads.at[HID:HID + 1, 0:HEAD_N].set(
        jnp.concatenate([p["bmu"], p["bsig"], p["bpi"]], axis=1))

    # Per-column LeakyReLU slope: 0.1 on sigma columns, 1.0 elsewhere (incl. padding).
    slope = jnp.ones((1, HEAD_PAD), jnp.float32).at[:, SIG_LO:SIG_HI].set(0.1)
    return vec, wenc, w_heads, slope


def _vmem_limit_bytes(B, col_block):
    est = 4 * (2 * (B + 10 * HID + CAT_W * 3 * HID + HEAD_K * col_block + col_block)
               + 2 * B * col_block          # double-buffered output slab
               + 8 * B * CAT_W)             # headroom for live intermediates / spills
    est += 2 * (1 << 20)
    return int(min(64 * (1 << 20), max(4 * (1 << 20), est)))


def density_network_forward(x, packed, *, col_block=HEAD_PAD):
    """col_block=HEAD_PAD -> single program (small/medium B, latency-bound).
    col_block=128 -> 3 "parallel" programs over head-column tiles: each redoes the tiny
    encoder on the full batch (training-mode BN stays exact) but splits the
    writeback-bound head matmul + lane-dense store across v7x's two TensorCores."""
    vec, wenc, w_heads, slope = packed
    B = x.shape[0]
    assert HEAD_PAD % col_block == 0 and col_block % 128 == 0
    n_col = HEAD_PAD // col_block

    cost = pl.CostEstimate(
        flops=2 * B * (3 * CAT_W * HID + HEAD_K * HEAD_PAD) + 24 * B * HID,
        transcendentals=4 * HID,
        bytes_accessed=4 * (B + vec.size + wenc.size + w_heads.size
                            + slope.size + B * HEAD_PAD),
    )
    out = pl.pallas_call(
        _density_kernel,
        out_shape=jax.ShapeDtypeStruct((B, HEAD_PAD), jnp.float32),
        grid=(n_col,),
        in_specs=[
            pl.BlockSpec((B, 1), lambda j: (0, 0)),
            pl.BlockSpec((10, HID), lambda j: (0, 0)),
            pl.BlockSpec((CAT_W, 3 * HID), lambda j: (0, 0)),
            pl.BlockSpec((HEAD_K, col_block), lambda j: (0, j)),
            pl.BlockSpec((1, col_block), lambda j: (0, j)),
        ],
        out_specs=pl.BlockSpec((B, col_block), lambda j: (0, j)),
        compiler_params=pltpu.CompilerParams(
            dimension_semantics=("parallel",),
            vmem_limit_bytes=_vmem_limit_bytes(B, col_block),
        ),
        cost_estimate=cost,
    )(x, vec, wenc, w_heads, slope)
    return out[:, :HEAD_N]


def make_params(key):
    def linear(k, fan_in, fan_out):
        kw, kb = jax.random.split(k)
        bound = 1.0 / math.sqrt(fan_in)
        w = jax.random.uniform(kw, (fan_in, fan_out), jnp.float32, -bound, bound)
        b = jax.random.uniform(kb, (1, fan_out), jnp.float32, -bound, bound)
        return w, b

    keys = jax.random.split(key, 7)
    p = {}
    p["w1"], p["b1"] = linear(keys[0], 1, HID)
    p["w2"], p["b2"] = linear(keys[1], HID + 1, HID)
    p["w3"], p["b3"] = linear(keys[2], 2 * HID + 1, HID)
    p["w4"], p["b4"] = linear(keys[3], 3 * HID + 1, HID)
    p["wmu"], p["bmu"] = linear(keys[4], HID, N_MIXES * OUTPUT_DIMS)
    p["wsig"], p["bsig"] = linear(keys[5], HID, N_MIXES * OUTPUT_DIMS)
    p["wpi"], p["bpi"] = linear(keys[6], HID, N_MIXES)
    for i in (1, 2, 3, 4):
        p[f"g{i}"] = jnp.ones((1, HID), jnp.float32)    # BatchNorm gamma
        p[f"be{i}"] = jnp.zeros((1, HID), jnp.float32)  # BatchNorm beta
    return p


def reference_forward(x, p):
    """Pure-JAX reference mirroring the PyTorch forward (explicit concats, all biases)."""
    def bn_relu(h, g, be):
        mean = jnp.mean(h, axis=0, keepdims=True)
        var = jnp.mean((h - mean) ** 2, axis=0, keepdims=True)
        return jnp.maximum((h - mean) / jnp.sqrt(var + EPS) * g + be, 0.0)

    y = x
    h = bn_relu(x @ p["w1"] + p["b1"], p["g1"], p["be1"])
    cat = jnp.concatenate([h, y], axis=1)
    h = bn_relu(cat @ p["w2"] + p["b2"], p["g2"], p["be2"])
    cat = jnp.concatenate([h, cat], axis=1)
    h = bn_relu(cat @ p["w3"] + p["b3"], p["g3"], p["be3"])
    cat = jnp.concatenate([h, cat], axis=1)
    h = bn_relu(cat @ p["w4"] + p["b4"], p["g4"], p["be4"])
    mus = h @ p["wmu"] + p["bmu"]
    sig = h @ p["wsig"] + p["bsig"]
    sig = jnp.where(sig >= 0.0, sig, 0.1 * sig)
    pi = h @ p["wpi"] + p["bpi"]
    return jnp.concatenate([mus, sig, pi], axis=1)


if __name__ == "__main__":
    key = jax.random.PRNGKey(0)
    k_x, k_p = jax.random.split(key)
    B = 8  # multiple of 8 -> full sublane tiles; BN in training mode needs B >= 2
    x = jax.random.normal(k_x, (B, 1), jnp.float32)
    params = make_params(k_p)
    packed = pack_params(params)

    ref = jax.block_until_ready(reference_forward(x, params))

    # Single-program path (default for small/medium B).
    out = jax.block_until_ready(density_network_forward(x, packed))
    assert out.shape == (B, HEAD_N), out.shape
    assert jnp.allclose(out, ref, atol=1e-4, rtol=1e-4), float(jnp.max(jnp.abs(out - ref)))

    # Column-tiled path (3 parallel programs; v7x dual-TensorCore large-B variant).
    out_tiled = jax.block_until_ready(density_network_forward(x, packed, col_block=128))
    assert out_tiled.shape == (B, HEAD_N), out_tiled.shape
    assert jnp.allclose(out_tiled, ref, atol=1e-4, rtol=1e-4), \
        float(jnp.max(jnp.abs(out_tiled - ref)))

    print("KERNEL_OK")
</pallas_src>

<mosaic_0001>
module attributes {stable_mosaic.version = 11 : i64} {
  func.func @_density_kernel(%arg0: i32, %arg1: memref<8x1xf32, #tpu.memory_space<vmem>>, %arg2: memref<10x16xf32, #tpu.memory_space<vmem>>, %arg3: memref<64x48xf32, #tpu.memory_space<vmem>>, %arg4: memref<32x384xf32, #tpu.memory_space<vmem>>, %arg5: memref<1x384xf32, #tpu.memory_space<vmem>>, %arg6: memref<8x384xf32, #tpu.memory_space<vmem>>) attributes {dimension_semantics = [#tpu.dimension_semantics<parallel>], iteration_bounds = array<i64: 1>, scalar_prefetch = 0 : i64, scratch_operands = 0 : i64, tpu.core_type = #tpu.core_type<tc>, window_params = [{pipeline_mode = #tpu.pipeline_mode<synchronous>, transform_indices = @transform_0, window_bounds = array<i64: 8, 1>}, {pipeline_mode = #tpu.pipeline_mode<synchronous>, transform_indices = @transform_1, window_bounds = array<i64: 10, 16>}, {pipeline_mode = #tpu.pipeline_mode<synchronous>, transform_indices = @transform_2, window_bounds = array<i64: 64, 48>}, {transform_indices = @transform_3, window_bounds = array<i64: 32, 384>}, {transform_indices = @transform_4, window_bounds = array<i64: 1, 384>}, {transform_indices = @transform_5, window_bounds = array<i64: 8, 384>}]} {
    %c0 = arith.constant 0 : index
    %c0_0 = arith.constant 0 : index
    %0 = vector.load %arg1[%c0, %c0_0] : memref<8x1xf32, #tpu.memory_space<vmem>>, vector<8x1xf32>
    %cst = arith.constant 1.000000e+00 : f32
    %1 = vector.broadcast %cst : f32 to vector<8x1xf32>
    %c0_1 = arith.constant 0 : index
    %c0_2 = arith.constant 0 : index
    %2 = vector.load %arg2[%c0_1, %c0_2] : memref<10x16xf32, #tpu.memory_space<vmem>>, vector<1x16xf32>
    %3 = vector.broadcast %0 : vector<8x1xf32> to vector<8x16xf32>
    %4 = vector.broadcast %2 : vector<1x16xf32> to vector<8x16xf32>
    %5 = arith.mulf %3, %4 : vector<8x16xf32>
    %c1 = arith.constant 1 : index
    %c0_3 = arith.constant 0 : index
    %6 = vector.load %arg2[%c1, %c0_3] : memref<10x16xf32, #tpu.memory_space<vmem>>, vector<1x16xf32>
    %7 = vector.broadcast %6 : vector<1x16xf32> to vector<8x16xf32>
    %8 = arith.addf %5, %7 : vector<8x16xf32>
    %c2 = arith.constant 2 : index
    %c0_4 = arith.constant 0 : index
    %9 = vector.load %arg2[%c2, %c0_4] : memref<10x16xf32, #tpu.memory_space<vmem>>, vector<1x16xf32>
    %c6 = arith.constant 6 : index
    %c0_5 = arith.constant 0 : index
    %10 = vector.load %arg2[%c6, %c0_5] : memref<10x16xf32, #tpu.memory_space<vmem>>, vector<1x16xf32>
    %11 = arith.mulf %8, %8 : vector<8x16xf32>
    %12 = tpu.concatenate %8, %11 in 1 : vector<8x16xf32>, vector<8x16xf32> -> vector<8x32xf32>
    %cst_6 = arith.constant dense<0.000000e+00> : vector<32xf32>
    %13 = vector.multi_reduction <add>, %12, %cst_6 [0] : vector<8x32xf32> to vector<32xf32>
    %14 = vector.shape_cast %13 : vector<32xf32> to vector<1x32xf32>
    %cst_7 = arith.constant 8.000000e+00 : f32
    %15 = vector.broadcast %cst_7 : f32 to vector<1x32xf32>
    %16 = arith.divf %14, %15 : vector<1x32xf32>
    %17 = vector.extract_strided_slice %16 {offsets = [0, 0], sizes = [1, 16], strides = [1, 1]} : vector<1x32xf32> to vector<1x16xf32>
    %18 = vector.extract_strided_slice %16 {offsets = [0, 16], sizes = [1, 16], strides = [1, 1]} : vector<1x32xf32> to vector<1x16xf32>
    %19 = arith.mulf %17, %17 : vector<1x16xf32>
    %20 = arith.subf %18, %19 : vector<1x16xf32>
    %cst_8 = arith.constant 0.000000e+00 : f32
    %21 = vector.broadcast %cst_8 : f32 to vector<1x16xf32>
    %22 = arith.maximumf %20, %21 : vector<1x16xf32>
    %cst_9 = arith.constant 9.99999974E-6 : f32
    %23 = vector.broadcast %cst_9 : f32 to vector<1x16xf32>
    %24 = arith.addf %22, %23 : vector<1x16xf32>
    %25 = math.rsqrt %24 : vector<1x16xf32>
    %26 = arith.mulf %9, %25 : vector<1x16xf32>
    %27 = arith.mulf %17, %26 : vector<1x16xf32>
    %28 = arith.subf %10, %27 : vector<1x16xf32>
    %29 = vector.broadcast %26 : vector<1x16xf32> to vector<8x16xf32>
    %30 = arith.mulf %8, %29 : vector<8x16xf32>
    %31 = vector.broadcast %28 : vector<1x16xf32> to vector<8x16xf32>
    %32 = arith.addf %30, %31 : vector<8x16xf32>
    %cst_10 = arith.constant 0.000000e+00 : f32
    %33 = vector.broadcast %cst_10 : f32 to vector<8x16xf32>
    %34 = arith.maximumf %32, %33 : vector<8x16xf32>
    %cst_11 = arith.constant 0.000000e+00 : f32
    %35 = vector.broadcast %cst_11 : f32 to vector<8x46xf32>
    %36 = tpu.concatenate %34, %0, %1, %35 in 1 : vector<8x16xf32>, vector<8x1xf32>, vector<8x1xf32>, vector<8x46xf32> -> vector<8x64xf32>
    %c0_12 = arith.constant 0 : index
    %c0_13 = arith.constant 0 : index
    %37 = vector.load %arg3[%c0_12, %c0_13] : memref<64x48xf32, #tpu.memory_space<vmem>>, vector<64x16xf32>
    %cst_14 = arith.constant dense<0.000000e+00> : vector<8x16xf32>
    %38 = tpu.matmul %36, %37, %cst_14 {dimension_numbers = #tpu.dot_dimension_numbers<[1], [0], [0], [1], [0, 0, 1, 1], [], []>} : vector<8x64xf32>, vector<64x16xf32>, vector<8x16xf32> -> vector<8x16xf32>
    %c3 = arith.constant 3 : index
    %c0_15 = arith.constant 0 : index
    %39 = vector.load %arg2[%c3, %c0_15] : memref<10x16xf32, #tpu.memory_space<vmem>>, vector<1x16xf32>
    %c7 = arith.constant 7 : index
    %c0_16 = arith.constant 0 : index
    %40 = vector.load %arg2[%c7, %c0_16] : memref<10x16xf32, #tpu.memory_space<vmem>>, vector<1x16xf32>
    %41 = arith.mulf %38, %38 : vector<8x16xf32>
    %42 = tpu.concatenate %38, %41 in 1 : vector<8x16xf32>, vector<8x16xf32> -> vector<8x32xf32>
    %cst_17 = arith.constant dense<0.000000e+00> : vector<32xf32>
    %43 = vector.multi_reduction <add>, %42, %cst_17 [0] : vector<8x32xf32> to vector<32xf32>
    %44 = vector.shape_cast %43 : vector<32xf32> to vector<1x32xf32>
    %cst_18 = arith.constant 8.000000e+00 : f32
    %45 = vector.broadcast %cst_18 : f32 to vector<1x32xf32>
    %46 = arith.divf %44, %45 : vector<1x32xf32>
    %47 = vector.extract_strided_slice %46 {offsets = [0, 0], sizes = [1, 16], strides = [1, 1]} : vector<1x32xf32> to vector<1x16xf32>
    %48 = vector.extract_strided_slice %46 {offsets = [0, 16], sizes = [1, 16], strides = [1, 1]} : vector<1x32xf32> to vector<1x16xf32>
    %49 = arith.mulf %47, %47 : vector<1x16xf32>
    %50 = arith.subf %48, %49 : vector<1x16xf32>
    %cst_19 = arith.constant 0.000000e+00 : f32
    %51 = vector.broadcast %cst_19 : f32 to vector<1x16xf32>
    %52 = arith.maximumf %50, %51 : vector<1x16xf32>
    %cst_20 = arith.constant 9.99999974E-6 : f32
    %53 = vector.broadcast %cst_20 : f32 to vector<1x16xf32>
    %54 = arith.addf %52, %53 : vector<1x16xf32>
    %55 = math.rsqrt %54 : vector<1x16xf32>
    %56 = arith.mulf %39, %55 : vector<1x16xf32>
    %57 = arith.mulf %47, %56 : vector<1x16xf32>
    %58 = arith.subf %40, %57 : vector<1x16xf32>
    %59 = vector.broadcast %56 : vector<1x16xf32> to vector<8x16xf32>
    %60 = arith.mulf %38, %59 : vector<8x16xf32>
    %61 = vector.broadcast %58 : vector<1x16xf32> to vector<8x16xf32>
    %62 = arith.addf %60, %61 : vector<8x16xf32>
    %cst_21 = arith.constant 0.000000e+00 : f32
    %63 = vector.broadcast %cst_21 : f32 to vector<8x16xf32>
    %64 = arith.maximumf %62, %63 : vector<8x16xf32>
    %cst_22 = arith.constant 0.000000e+00 : f32
    %65 = vector.broadcast %cst_22 : f32 to vector<8x30xf32>
    %66 = tpu.concatenate %64, %34, %0, %1, %65 in 1 : vector<8x16xf32>, vector<8x16xf32>, vector<8x1xf32>, vector<8x1xf32>, vector<8x30xf32> -> vector<8x64xf32>
    %c0_23 = arith.constant 0 : index
    %c16 = arith.constant 16 : index
    %67 = vector.load %arg3[%c0_23, %c16] : memref<64x48xf32, #tpu.memory_space<vmem>>, vector<64x16xf32>
    %cst_24 = arith.constant dense<0.000000e+00> : vector<8x16xf32>
    %68 = tpu.matmul %66, %67, %cst_24 {dimension_numbers = #tpu.dot_dimension_numbers<[1], [0], [0], [1], [0, 0, 1, 1], [], []>} : vector<8x64xf32>, vector<64x16xf32>, vector<8x16xf32> -> vector<8x16xf32>
    %c4 = arith.constant 4 : index
    %c0_25 = arith.constant 0 : index
    %69 = vector.load %arg2[%c4, %c0_25] : memref<10x16xf32, #tpu.memory_space<vmem>>, vector<1x16xf32>
    %c8 = arith.constant 8 : index
    %c0_26 = arith.constant 0 : index
    %70 = vector.load %arg2[%c8, %c0_26] : memref<10x16xf32, #tpu.memory_space<vmem>>, vector<1x16xf32>
    %71 = arith.mulf %68, %68 : vector<8x16xf32>
    %72 = tpu.concatenate %68, %71 in 1 : vector<8x16xf32>, vector<8x16xf32> -> vector<8x32xf32>
    %cst_27 = arith.constant dense<0.000000e+00> : vector<32xf32>
    %73 = vector.multi_reduction <add>, %72, %cst_27 [0] : vector<8x32xf32> to vector<32xf32>
    %74 = vector.shape_cast %73 : vector<32xf32> to vector<1x32xf32>
    %cst_28 = arith.constant 8.000000e+00 : f32
    %75 = vector.broadcast %cst_28 : f32 to vector<1x32xf32>
    %76 = arith.divf %74, %75 : vector<1x32xf32>
    %77 = vector.extract_strided_slice %76 {offsets = [0, 0], sizes = [1, 16], strides = [1, 1]} : vector<1x32xf32> to vector<1x16xf32>
    %78 = vector.extract_strided_slice %76 {offsets = [0, 16], sizes = [1, 16], strides = [1, 1]} : vector<1x32xf32> to vector<1x16xf32>
    %79 = arith.mulf %77, %77 : vector<1x16xf32>
    %80 = arith.subf %78, %79 : vector<1x16xf32>
    %cst_29 = arith.constant 0.000000e+00 : f32
    %81 = vector.broadcast %cst_29 : f32 to vector<1x16xf32>
    %82 = arith.maximumf %80, %81 : vector<1x16xf32>
    %cst_30 = arith.constant 9.99999974E-6 : f32
    %83 = vector.broadcast %cst_30 : f32 to vector<1x16xf32>
    %84 = arith.addf %82, %83 : vector<1x16xf32>
    %85 = math.rsqrt %84 : vector<1x16xf32>
    %86 = arith.mulf %69, %85 : vector<1x16xf32>
    %87 = arith.mulf %77, %86 : vector<1x16xf32>
    %88 = arith.subf %70, %87 : vector<1x16xf32>
    %89 = vector.broadcast %86 : vector<1x16xf32> to vector<8x16xf32>
    %90 = arith.mulf %68, %89 : vector<8x16xf32>
    %91 = vector.broadcast %88 : vector<1x16xf32> to vector<8x16xf32>
    %92 = arith.addf %90, %91 : vector<8x16xf32>
    %cst_31 = arith.constant 0.000000e+00 : f32
    %93 = vector.broadcast %cst_31 : f32 to vector<8x16xf32>
    %94 = arith.maximumf %92, %93 : vector<8x16xf32>
    %cst_32 = arith.constant 0.000000e+00 : f32
    %95 = vector.broadcast %cst_32 : f32 to vector<8x14xf32>
    %96 = tpu.concatenate %94, %64, %34, %0, %1, %95 in 1 : vector<8x16xf32>, vector<8x16xf32>, vector<8x16xf32>, vector<8x1xf32>, vector<8x1xf32>, vector<8x14xf32> -> vector<8x64xf32>
    %c0_33 = arith.constant 0 : index
    %c32 = arith.constant 32 : index
    %97 = vector.load %arg3[%c0_33, %c32] : memref<64x48xf32, #tpu.memory_space<vmem>>, vector<64x16xf32>
    %cst_34 = arith.constant dense<0.000000e+00> : vector<8x16xf32>
    %98 = tpu.matmul %96, %97, %cst_34 {dimension_numbers = #tpu.dot_dimension_numbers<[1], [0], [0], [1], [0, 0, 1, 1], [], []>} : vector<8x64xf32>, vector<64x16xf32>, vector<8x16xf32> -> vector<8x16xf32>
    %c5 = arith.constant 5 : index
    %c0_35 = arith.constant 0 : index
    %99 = vector.load %arg2[%c5, %c0_35] : memref<10x16xf32, #tpu.memory_space<vmem>>, vector<1x16xf32>
    %c9 = arith.constant 9 : index
    %c0_36 = arith.constant 0 : index
    %100 = vector.load %arg2[%c9, %c0_36] : memref<10x16xf32, #tpu.memory_space<vmem>>, vector<1x16xf32>
    %101 = arith.mulf %98, %98 : vector<8x16xf32>
    %102 = tpu.concatenate %98, %101 in 1 : vector<8x16xf32>, vector<8x16xf32> -> vector<8x32xf32>
    %cst_37 = arith.constant dense<0.000000e+00> : vector<32xf32>
    %103 = vector.multi_reduction <add>, %102, %cst_37 [0] : vector<8x32xf32> to vector<32xf32>
    %104 = vector.shape_cast %103 : vector<32xf32> to vector<1x32xf32>
    %cst_38 = arith.constant 8.000000e+00 : f32
    %105 = vector.broadcast %cst_38 : f32 to vector<1x32xf32>
    %106 = arith.divf %104, %105 : vector<1x32xf32>
    %107 = vector.extract_strided_slice %106 {offsets = [0, 0], sizes = [1, 16], strides = [1, 1]} : vector<1x32xf32> to vector<1x16xf32>
    %108 = vector.extract_strided_slice %106 {offsets = [0, 16], sizes = [1, 16], strides = [1, 1]} : vector<1x32xf32> to vector<1x16xf32>
    %109 = arith.mulf %107, %107 : vector<1x16xf32>
    %110 = arith.subf %108, %109 : vector<1x16xf32>
    %cst_39 = arith.constant 0.000000e+00 : f32
    %111 = vector.broadcast %cst_39 : f32 to vector<1x16xf32>
    %112 = arith.maximumf %110, %111 : vector<1x16xf32>
    %cst_40 = arith.constant 9.99999974E-6 : f32
    %113 = vector.broadcast %cst_40 : f32 to vector<1x16xf32>
    %114 = arith.addf %112, %113 : vector<1x16xf32>
    %115 = math.rsqrt %114 : vector<1x16xf32>
    %116 = arith.mulf %99, %115 : vector<1x16xf32>
    %117 = arith.mulf %107, %116 : vector<1x16xf32>
    %118 = arith.subf %100, %117 : vector<1x16xf32>
    %119 = vector.broadcast %116 : vector<1x16xf32> to vector<8x16xf32>
    %120 = arith.mulf %98, %119 : vector<8x16xf32>
    %121 = vector.broadcast %118 : vector<1x16xf32> to vector<8x16xf32>
    %122 = arith.addf %120, %121 : vector<8x16xf32>
    %cst_41 = arith.constant 0.000000e+00 : f32
    %123 = vector.broadcast %cst_41 : f32 to vector<8x16xf32>
    %124 = arith.maximumf %122, %123 : vector<8x16xf32>
    %cst_42 = arith.constant 0.000000e+00 : f32
    %125 = vector.broadcast %cst_42 : f32 to vector<8x15xf32>
    %126 = tpu.concatenate %124, %1, %125 in 1 : vector<8x16xf32>, vector<8x1xf32>, vector<8x15xf32> -> vector<8x32xf32>
    %c0_43 = arith.constant 0 : index
    %c0_44 = arith.constant 0 : index
    %127 = vector.load %arg4[%c0_43, %c0_44] : memref<32x384xf32, #tpu.memory_space<vmem>>, vector<32x384xf32>
    %cst_45 = arith.constant dense<0.000000e+00> : vector<8x384xf32>
    %128 = tpu.matmul %126, %127, %cst_45 {dimension_numbers = #tpu.dot_dimension_numbers<[1], [0], [0], [1], [0, 0, 1, 1], [], []>} : vector<8x32xf32>, vector<32x384xf32>, vector<8x384xf32> -> vector<8x384xf32>
    %c0_46 = arith.constant 0 : index
    %c0_47 = arith.constant 0 : index
    %129 = vector.load %arg5[%c0_46, %c0_47] : memref<1x384xf32, #tpu.memory_space<vmem>>, vector<1x384xf32>
    %cst_48 = arith.constant 0.000000e+00 : f32
    %130 = vector.broadcast %cst_48 : f32 to vector<8x384xf32>
    %131 = arith.cmpf olt, %128, %130 : vector<8x384xf32>
    %132 = vector.broadcast %129 : vector<1x384xf32> to vector<8x384xf32>
    %133 = arith.mulf %128, %132 : vector<8x384xf32>
    %134 = arith.select %131, %133, %128 : vector<8x384xi1>, vector<8x384xf32>
    %c0_49 = arith.constant 0 : index
    %c0_50 = arith.constant 0 : index
    %135 = vector.load %arg6[%c0_49, %c0_50] : memref<8x384xf32, #tpu.memory_space<vmem>>, vector<8x384xf32>
    tpu.vector_store %arg6[%c0_49, %c0_50], %134 {strides = array<i32>} : memref<8x384xf32, #tpu.memory_space<vmem>>, vector<8x384xf32>,
    return
  }
  func.func @transform_0(%arg0: i32) -> (i32, i32) {
    %c0_i32 = arith.constant 0 : i32
    %c0_i32_0 = arith.constant 0 : i32
    %c0_i32_1 = arith.constant 0 : i32
    return %c0_i32, %c0_i32_0 : i32, i32
  }
  func.func @transform_1(%arg0: i32) -> (i32, i32) {
    %c0_i32 = arith.constant 0 : i32
    %c0_i32_0 = arith.constant 0 : i32
    %c0_i32_1 = arith.constant 0 : i32
    return %c0_i32, %c0_i32_0 : i32, i32
  }
  func.func @transform_2(%arg0: i32) -> (i32, i32) {
    %c0_i32 = arith.constant 0 : i32
    %c0_i32_0 = arith.constant 0 : i32
    %c0_i32_1 = arith.constant 0 : i32
    return %c0_i32, %c0_i32_0 : i32, i32
  }
  func.func @transform_3(%arg0: i32) -> (i32, i32) {
    %c0_i32 = arith.constant 0 : i32
    %c0_i32_0 = arith.constant 0 : i32
    return %c0_i32, %arg0 : i32, i32
  }
  func.func @transform_4(%arg0: i32) -> (i32, i32) {
    %c0_i32 = arith.constant 0 : i32
    %c0_i32_0 = arith.constant 0 : i32
    return %c0_i32, %arg0 : i32, i32
  }
  func.func @transform_5(%arg0: i32) -> (i32, i32) {
    %c0_i32 = arith.constant 0 : i32
    %c0_i32_0 = arith.constant 0 : i32
    return %c0_i32, %arg0 : i32, i32
  }
}

</mosaic_0001>

<bundles_post_ra>
// kernel: tpu_custom_call.1
= control target key start
LH: loop header
LB: loop body
LE: loop exit
PB: predicated region body
PF: predicated region fallthrough
CT: control target
= control target key end

     0   :  { %v885_v1 = vmov 0   ;;  %s1187_s0 = inlined_call_operand.vmem [shape: f32[8,1], index: 0, kind: input, shape index: {}]   ;;  %s1188_s1 = inlined_call_operand.vmem [shape: f32[10,16], index: 1, kind: input, shape index: {}]   ;;  %s1189_s2 = inlined_call_operand.vmem [shape: f32[64,48], index: 2, kind: input, shape index: {}]   ;;  %s1190_s3 = inlined_call_operand.vmem [shape: f32[32,384], index: 3, kind: input, shape index: {}]   ;;  %s1191_s4 = inlined_call_operand.vmem [shape: f32[1,384], index: 4, kind: input, shape index: {}]   ;;  %s1192_s5 = inlined_call_operand.hbm [shape: f32[8,384], index: 5, kind: output, shape index: {}]  }
   0x1   :  { %v927_v0 = vld [vmem:[%s1187_s0] sm:$0xff]  ;;  %854 = vset.pattern.permute.xlu0 %v885_v1 }
   0x2   :  { %10 = vsyncpa [#allocation3], 0  ;;  %25 = vperm.xlu0 %854, %v927_v0   ;;  %v738_v2 = vld [vmem:[%s1188_s1] ss:$0 sm:$0xff]  ;;  %v739_v3 = vld [vmem:[%s1188_s1 + $0x1] ss:$0 sm:$0xff]  ;;  %v74_v33 = vlaneseq }
   0x3   :  { %s886_s0 = smov 16   ;;  %vm46_vm0 = vcmask 130048   ;;  %vm48_vm1 = vcmask 261120   ;;  %v887_v19 = vmov 0.0   ;;  %v952_v24 = vld [vmem:[%s1189_s2 + $0x38] sm:$0xff]  ;;  %v959_v25 = vld [vmem:[%s1189_s2 + $0x30] sm:$0xff] }
   0x4   :  { %777 = vmatprep.subr.mxu0 %v887_v19  ;;  %796 = vmatprep.subr.mxu1 %v887_v19  ;;  %v966_v26 = vld [vmem:[%s1189_s2 + $0x28] sm:$0xff]  ;;  %v973_v27 = vld [vmem:[%s1189_s2 + $0x20] sm:$0xff]  ;;  %v980_v28 = vld [vmem:[%s1189_s2 + $0x18] sm:$0xff]  ;;  %s888_s13 = smov 112   ;;  %vm889_vm2 = vmmov 0   ;;  %v1010_v34 = vshrl.u32 %v74_v33, 7 }
   0x5   :  { %778 = vmatpush3.msra.mxu0 %v952_v24  ;;  %v986_v29 = vld [vmem:[%s1189_s2 + $0x10] sm:$0xff]  ;;  %v994_v30 = vld [vmem:[%s1189_s2 + $0x8] sm:$0xff]  ;;  %v1002_v32 = vld [vmem:[%s1189_s2] sm:$0xff]  ;;  %793 = vmatprep.mubr.msk.f32.mxu0 %vm889_vm2, %v887_v19  ;;  %vm89_vm3 = vcmask 138240   ;;  %vm91_vm4 = vcmask 146432   ;;  %vm101_vm5 = vcmask 523264  }
   0x6   :  { %779 = vmatprep.subr.mxu0 %v887_v19  ;;  %812 = vmatprep.mubr.msk.f32.mxu1 %vm889_vm2, %v887_v19  ;;  %v39_v35 = vld [vmem:[%s1188_s1 + $0x2] sm:$0x1]  ;;  %v1016_v36 = vsub.s32 0, %v1010_v34  ;;  %v40_v39 = vld [vmem:[%s1188_s1 + $0x6] sm:$0x1]  ;;  %s890_s19 = smov 32  }
   0x7   :  { %780 = vmatpush3.msra.mxu0 %v959_v25  ;;  %vm227_vm6 = vcmask 269312   ;;  %vm229_vm7 = vcmask 277504   ;;  %s891_s24 = smov 96   ;;  %s892_s25 = smov 48   ;;  %vm391_vm8 = vcmask 392192   ;;  %vm393_vm9 = vcmask 400384  }
   0x8   :  { %781 = vmatprep.subr.mxu0 %v887_v19  ;;  %vm395_vm10 = vcmask 408576  }
   0x9   :  { %782 = vmatpush3.msra.mxu0 %v966_v26 }
   0xa   :  { %783 = vmatprep.subr.mxu0 %v887_v19 }
   0xb   :  { %784 = vmatpush3.msra.mxu0 %v973_v27 }
   0xc   :  { %785 = vmatprep.subr.mxu0 %v887_v19 }
   0xd   :  { %786 = vmatpush3.msra.mxu0 %v980_v28 }
   0xe   :  { %787 = vmatprep.subr.mxu0 %v887_v19 }
   0xf   :  { %788 = vmatpush3.msra.mxu0 %v986_v29 }
  0x10   :  { %789 = vmatprep.subr.mxu0 %v887_v19 }
  0x11   :  { %790 = vmatpush3.msra.mxu0 %v994_v30 }
  0x12   :  { %791 = vmatprep.subr.mxu0 %v887_v19 }
  0x13   :  { %792 = vmatpush3.msra.mxu0 %v1002_v32 }
  0x14   :  { %815 = vmatprep.subr.mxu0 %v887_v19 }
  0x7d   :  { %v26_v4 = vpop.permute.xlu0 %25 }
  0x7e   :  { %v32_v5 = vmul.f32 %v738_v2, %v26_v4 }
  0x80   :  { %v936_v6 = vadd.f32 %v739_v3, %v32_v5 }
  0x82   :  { %v41_v7 = vmul.f32 %v936_v6, %v936_v6 }
  0x84   :  { %43 = vrot.lane.b32.xlu0 %v41_v7, %s886_s0 }
  0x88   :  { %85 = vrot.lane.b32.xlu0 %v927_v0, %s886_s0 }
  0xf6   :  { %v44_v8 = vpop.permute.xlu0 %43 }
  0xf7   :  { %v47_v9 = vsel %vm46_vm0, %v936_v6, %v44_v8 }
  0xf8   :  { %v49_v10 = vsel %vm48_vm1, %v47_v9, 0.0 }
  0xf9   :  { %v50_v11 = vrot.slane %v49_v10, 4 }
  0xfa   :  { %v86_v46 = vpop.permute.xlu0 %85 }
  0xfb   :  { %v51_v12 = vadd.f32 %v50_v11, %v49_v10  ;;  %v175_v11 = vld [vmem:[%s1188_s1 + $0x3] sm:$0x1] }
  0xfd   :  { %v52_v13 = vrot.slane %v51_v12, 2 }
  0xff   :  { %v53_v14 = vadd.f32 %v52_v13, %v51_v12 }
 0x101   :  { %v54_v15 = vrot.slane %v53_v14, 1 }
 0x103   :  { %v55_v16 = vadd.f32 %v54_v15, %v53_v14  ;;  %v176_v14 = vld [vmem:[%s1188_s1 + $0x7] sm:$0x1] }
 0x105   :  { %v57_v17 = vmul.f32 0.125, %v55_v16 }
 0x107   :  { %v58_v18 = vmul.f32 %v57_v17, %v57_v17 }
 0x109   :  { %60 = vrot.lane.b32.xlu1 %v58_v18, %s886_s0 }
 0x17b   :  { %v61_v20 = vpop.permute.xlu1 %60 }
 0x17c   :  { %v63_v21 = vsub.f32 %v57_v17, %v61_v20 }
 0x17e   :  { %v64_v22 = vmax.f32 %v63_v21, 0.0 }
 0x180   :  { %v65_v23 = vadd.f32 1e-05, %v64_v22 }
 0x182   :  { %855 = vrsqrt.f32 %v65_v23 }
 0x18f   :  { %v856_v31 = vpop.eup %855 }
 0x190   :  { %68 = vrot.lane.b32.xlu1 %v856_v31, %s888_s13 }
 0x202   :  { %v69_v37 = vpop.permute.xlu1 %68 }
 0x203   :  { %v71_v38 = vmul.f32 %v69_v37, %v39_v35 }
 0x205   :  { %v72_v40 = vmul.f32 %v71_v38, %v57_v17  ;;  %v77_v41 = vrot.slane %v71_v38, %v1016_v36 }
 0x207   :  { %v73_v42 = vsub.f32 %v40_v39, %v72_v40  ;;  %v78_v43 = vmul.f32 %v77_v41, %v936_v6 }
 0x209   :  { %v82_v44 = vrot.slane %v73_v42, %v1016_v36 }
 0x20b   :  { %v83_v45 = vadd.f32 %v82_v44, %v78_v43 }
 0x20d   :  { %v1024_v47 = vmax.f32 %v83_v45, 0.0 }
 0x20f   :  { %v88_v48 = vsel %vm46_vm0, %v1024_v47, %v86_v46 }
 0x210   :  { %v90_v49 = vsel %vm89_vm3, %v88_v48, 1.0 }
 0x211   :  { %v92_v50 = vsel %vm91_vm4, %v90_v49, 0.0 }
 0x212   :  { %794 = vmatmul.mubr.msk.f32.vlgmr.msra.gmra.mxu0 %vm101_vm5, %v92_v50 }
 0x213   :  { %831 = vmatprep.mubr.msk.f32.mxu0 %vm889_vm2, %v887_v19 }
 0x2d2   :  { %v171_v51 = vpop.f32.mrf.mxu0 }
 0x2d3   :  { %v177_v52 = vmul.f32 %v171_v51, %v171_v51 }
 0x2d4   :  { %v795_v53 = vpop.f32.mrf.mxu0 }
 0x2d5   :  { %179 = vrot.lane.b32.xlu1 %v177_v52, %s886_s0 }
 0x2d9   :  { %251 = vrot.lane.b32.xlu1 %v959_v25, %s888_s13 }
 0x347   :  { %v180_v54 = vpop.permute.xlu1 %179 }
 0x348   :  { %v182_v55 = vsel %vm46_vm0, %v171_v51, %v180_v54 }
 0x349   :  { %v183_v56 = vsel %vm48_vm1, %v182_v55, 0.0 }
 0x34a   :  { %v184_v57 = vrot.slane %v183_v56, 4 }
 0x34b   :  { %v252_v6 = vpop.permute.xlu1 %251 }
 0x34c   :  { %v185_v58 = vadd.f32 %v184_v57, %v183_v56 }
 0x34e   :  { %v186_v59 = vrot.slane %v185_v58, 2 }
 0x350   :  { %v187_v60 = vadd.f32 %v186_v59, %v185_v58 }
 0x352   :  { %v188_v61 = vrot.slane %v187_v60, 1 }
 0x354   :  { %v189_v62 = vadd.f32 %v188_v61, %v187_v60 }
 0x356   :  { %v190_v63 = vmul.f32 0.125, %v189_v62 }
 0x358   :  { %v191_v1 = vmul.f32 %v190_v63, %v190_v63 }
 0x35a   :  { %193 = vrot.lane.b32.xlu0 %v191_v1, %s886_s0 }
 0x35e   :  { %253 = vrot.lane.b32.xlu0 %v952_v24, %s888_s13 }
 0x362   :  { %249 = vrot.lane.b32.xlu0 %v966_v26, %s888_s13 }
 0x366   :  { %245 = vrot.lane.b32.xlu0 %v980_v28, %s888_s13 }
 0x36a   :  { %219 = vrot.lane.b32.xlu0 %v1024_v47, %s886_s0 }
 0x36e   :  { %241 = vrot.lane.b32.xlu0 %v994_v30, %s888_s13 }
 0x3cc   :  { %v194_v2 = vpop.permute.xlu0 %193 }
 0x3cd   :  { %v196_v3 = vsub.f32 %v190_v63, %v194_v2 }
 0x3cf   :  { %v197_v4 = vmax.f32 %v196_v3, 0.0 }
 0x3d0   :  { %v254_v5 = vpop.permute.xlu0 %253 }
 0x3d1   :  { %v198_v7 = vadd.f32 1e-05, %v197_v4  ;;  %797 = vmatpush3.msra.mxu1 %v254_v5 }
 0x3d2   :  { %798 = vmatprep.subr.mxu1 %v887_v19 }
 0x3d3   :  { %857 = vrsqrt.f32 %v198_v7  ;;  %799 = vmatpush3.msra.mxu1 %v252_v6 }
 0x3d4   :  { %v250_v8 = vpop.permute.xlu0 %249  ;;  %800 = vmatprep.subr.mxu1 %v887_v19 }
 0x3d5   :  { %801 = vmatpush3.msra.mxu1 %v250_v8 }
 0x3d6   :  { %802 = vmatprep.subr.mxu1 %v887_v19 }
 0x3d8   :  { %v246_v10 = vpop.permute.xlu0 %245 }
 0x3dc   :  { %v220_v17 = vpop.permute.xlu0 %219 }
 0x3e0   :  { %v858_v9 = vpop.eup %857  ;;  %v242_v31 = vpop.permute.xlu0 %241 }
 0x3e1   :  { %201 = vrot.lane.b32.xlu1 %v858_v9, %s888_s13 }
 0x3e5   :  { %247 = vrot.lane.b32.xlu1 %v973_v27, %s888_s13 }
 0x3e9   :  { %243 = vrot.lane.b32.xlu1 %v986_v29, %s888_s13 }
 0x3ed   :  { %222 = vrot.lane.b32.xlu1 %v927_v0, %s890_s19 }
 0x3f1   :  { %239 = vrot.lane.b32.xlu1 %v1002_v32, %s888_s13 }
 0x453   :  { %v202_v12 = vpop.permute.xlu1 %201 }
 0x454   :  { %v204_v13 = vmul.f32 %v202_v12, %v175_v11 }
 0x456   :  { %v205_v15 = vmul.f32 %v204_v13, %v190_v63  ;;  %v210_v16 = vrot.slane %v204_v13, %v1016_v36  ;;  %v337_v63 = vld [vmem:[%s1188_s1 + $0x8] sm:$0x1] }
 0x457   :  { %v248_v18 = vpop.permute.xlu1 %247 }
 0x458   :  { %v206_v20 = vsub.f32 %v176_v14, %v205_v15  ;;  %803 = vmatpush3.msra.mxu1 %v248_v18  ;;  %v211_v21 = vmul.f32 %v210_v16, %v171_v51 }
 0x459   :  { %804 = vmatprep.subr.mxu1 %v887_v19 }
 0x45a   :  { %v215_v22 = vrot.slane %v206_v20, %v1016_v36  ;;  %805 = vmatpush3.msra.mxu1 %v246_v10 }
 0x45b   :  { %806 = vmatprep.subr.mxu1 %v887_v19  ;;  %v244_v23 = vpop.permute.xlu1 %243 }
 0x45c   :  { %v216_v33 = vadd.f32 %v215_v22, %v211_v21  ;;  %807 = vmatpush3.msra.mxu1 %v244_v23 }
 0x45d   :  { %808 = vmatprep.subr.mxu1 %v887_v19 }
 0x45e   :  { %v217_v35 = vmax.f32 %v216_v33, 0.0  ;;  %809 = vmatpush3.msra.mxu1 %v242_v31 }
 0x45f   :  { %v223_v37 = vpop.permute.xlu1 %222  ;;  %810 = vmatprep.subr.mxu1 %v887_v19 }
 0x460   :  { %v225_v38 = vsel %vm46_vm0, %v217_v35, %v220_v17 }
 0x461   :  { %v226_v39 = vsel %vm48_vm1, %v225_v38, %v223_v37 }
 0x462   :  { %v228_v40 = vsel %vm227_vm6, %v226_v39, 1.0 }
 0x463   :  { %v240_v41 = vpop.permute.xlu1 %239  ;;  %v230_v42 = vsel %vm229_vm7, %v228_v40, 0.0 }
 0x464   :  { %811 = vmatpush3.msra.mxu1 %v240_v41 }
 0x465   :  { %813 = vmatmul.mubr.msk.f32.vlgmr.msra.gmra.mxu1 %vm101_vm5, %v230_v42 }
 0x466   :  { %618 = vmatprep.mubr.f32.mxu1 %v887_v19 }
 0x525   :  { %v332_v43 = vpop.f32.mrf.mxu1 }
 0x526   :  { %v338_v44 = vmul.f32 %v332_v43, %v332_v43 }
 0x527   :  { %v814_v45 = vpop.f32.mrf.mxu1 }
 0x528   :  { %340 = vrot.lane.b32.xlu0 %v338_v44, %s886_s0 }
 0x52c   :  { %409 = vrot.lane.b32.xlu0 %v959_v25, %s891_s24 }
 0x59a   :  { %v341_v46 = vpop.permute.xlu0 %340 }
 0x59b   :  { %v343_v48 = vsel %vm46_vm0, %v332_v43, %v341_v46  ;;  %v549_v46 = vld [vmem:[%s1190_s3 + $0x50] sm:$0xff] }
 0x59c   :  { %v344_v49 = vsel %vm48_vm1, %v343_v48, 0.0  ;;  %578 = vmatprep.subr.mxu1 %v549_v46  ;;  %v548_v48 = vld [vmem:[%s1190_s3 + $0x48] sm:$0xff] }
 0x59d   :  { %v345_v50 = vrot.slane %v344_v49, 4  ;;  %579 = vmatpush1.msra.mxu1 %v548_v48 }
 0x59f   :  { %v346_v51 = vadd.f32 %v345_v50, %v344_v49  ;;  %v546_v49 = vld [vmem:[%s1190_s3 + $0x38] sm:$0xff]  ;;  %v545_v50 = vld [vmem:[%s1190_s3 + $0x30] sm:$0xff] }
 0x5a0   :  { %580 = vmatprep.subr.mxu1 %v546_v49 }
 0x5a1   :  { %v347_v52 = vrot.slane %v346_v51, 2  ;;  %581 = vmatpush1.msra.mxu1 %v545_v50 }
 0x5a3   :  { %v348_v53 = vadd.f32 %v347_v52, %v346_v51  ;;  %v543_v51 = vld [vmem:[%s1190_s3 + $0x20] sm:$0xff]  ;;  %v542_v52 = vld [vmem:[%s1190_s3 + $0x18] sm:$0xff] }
 0x5a4   :  { %582 = vmatprep.subr.mxu1 %v543_v51 }
 0x5a5   :  { %v349_v54 = vrot.slane %v348_v53, 1  ;;  %583 = vmatpush1.msra.mxu1 %v542_v52 }
 0x5a7   :  { %v350_v55 = vadd.f32 %v349_v54, %v348_v53  ;;  %v540_v53 = vld [vmem:[%s1190_s3 + $0x8] sm:$0xff]  ;;  %v539_v54 = vld [vmem:[%s1190_s3] sm:$0xff] }
 0x5a8   :  { %584 = vmatprep.subr.mxu1 %v540_v53 }
 0x5a9   :  { %v351_v56 = vmul.f32 0.125, %v350_v55  ;;  %585 = vmatpush1.msra.mxu1 %v539_v54 }
 0x5aa   :  { %834 = vmatprep.subr.mxu1 %v887_v19 }
 0x5ab   :  { %v352_v57 = vmul.f32 %v351_v56, %v351_v56 }
 0x5ad   :  { %354 = vrot.lane.b32.xlu1 %v352_v57, %s886_s0 }
 0x5b1   :  { %411 = vrot.lane.b32.xlu1 %v952_v24, %s891_s24  ;;  %v410_v24 = vpop.permute.xlu0 %409 }
 0x5b5   :  { %407 = vrot.lane.b32.xlu1 %v966_v26, %s891_s24 }
 0x5b9   :  { %403 = vrot.lane.b32.xlu1 %v980_v28, %s891_s24  ;;  %v336_v28 = vld [vmem:[%s1188_s1 + $0x4] sm:$0x1] }
 0x5bd   :  { %401 = vrot.lane.b32.xlu1 %v986_v29, %s891_s24 }
 0x5c1   :  { %386 = vrot.lane.b32.xlu1 %v927_v0, %s892_s25 }
 0x5c5   :  { %397 = vrot.lane.b32.xlu1 %v1002_v32, %s891_s24 }
 0x61f   :  { %v355_v25 = vpop.permute.xlu1 %354 }
 0x620   :  { %v357_v58 = vsub.f32 %v351_v56, %v355_v25 }
 0x622   :  { %v358_v59 = vmax.f32 %v357_v58, 0.0  ;;  %v495_v58 = vld [vmem:[%s1188_s1 + $0x9] sm:$0x1] }
 0x623   :  { %v412_v60 = vpop.permute.xlu1 %411 }
 0x624   :  { %v359_v61 = vadd.f32 1e-05, %v358_v59  ;;  %816 = vmatpush3.msra.mxu0 %v412_v60 }
 0x625   :  { %817 = vmatprep.subr.mxu0 %v887_v19 }
 0x626   :  { %859 = vrsqrt.f32 %v359_v61  ;;  %818 = vmatpush3.msra.mxu0 %v410_v24 }
 0x627   :  { %819 = vmatprep.subr.mxu0 %v887_v19  ;;  %v408_v26 = vpop.permute.xlu1 %407 }
 0x628   :  { %820 = vmatpush3.msra.mxu0 %v408_v26 }
 0x629   :  { %821 = vmatprep.subr.mxu0 %v887_v19 }
 0x62b   :  { %v404_v29 = vpop.permute.xlu1 %403 }
 0x62f   :  { %v402_v3 = vpop.permute.xlu1 %401 }
 0x633   :  { %v860_v0 = vpop.eup %859  ;;  %v387_v7 = vpop.permute.xlu1 %386 }
 0x634   :  { %362 = vrot.lane.b32.xlu0 %v860_v0, %s888_s13 }
 0x637   :  { %v398_v15 = vpop.permute.xlu1 %397 }
 0x638   :  { %405 = vrot.lane.b32.xlu0 %v973_v27, %s891_s24 }
 0x63c   :  { %380 = vrot.lane.b32.xlu0 %v217_v35, %s886_s0 }
 0x640   :  { %383 = vrot.lane.b32.xlu0 %v1024_v47, %s890_s19 }
 0x644   :  { %399 = vrot.lane.b32.xlu0 %v994_v30, %s891_s24 }
 0x6a6   :  { %v363_v32 = vpop.permute.xlu0 %362 }
 0x6a7   :  { %v365_v62 = vmul.f32 %v363_v32, %v336_v28  ;;  %v550_v32 = vld [vmem:[%s1190_s3 + $0x58] sm:$0xff] }
 0x6a9   :  { %v366_v27 = vmul.f32 %v365_v62, %v351_v56  ;;  %v371_v1 = vrot.slane %v365_v62, %v1016_v36  ;;  %v494_v56 = vld [vmem:[%s1188_s1 + $0x5] sm:$0x1] }
 0x6aa   :  { %v406_v2 = vpop.permute.xlu0 %405 }
 0x6ab   :  { %v367_v47 = vsub.f32 %v337_v63, %v366_v27  ;;  %822 = vmatpush3.msra.mxu0 %v406_v2  ;;  %v372_v30 = vmul.f32 %v371_v1, %v332_v43  ;;  %v547_v63 = vld [vmem:[%s1190_s3 + $0x40] sm:$0xff]  ;;  %v544_v27 = vld [vmem:[%s1190_s3 + $0x28] sm:$0xff]  ;;  %v541_v1 = vld [vmem:[%s1190_s3 + $0x10] sm:$0xff]  ;;  %s893_s3 = smov [#allocation2]  }
 0x6ac   :  { %823 = vmatprep.subr.mxu0 %v887_v19  ;;  %v695_v2 = vld [vmem:[%s1191_s4] sm:$0x7]  ;;  %s730_s4 = sshll.u32 %s893_s3, 4  ;;  %s731_s4 = int_to_ptr.vmem [resolvable:$true] %s730_s4 }
 0x6ad   :  { %v376_v4 = vrot.slane %v367_v47, %v1016_v36  ;;  %824 = vmatpush3.msra.mxu0 %v404_v29  ;;  %v703_v47 = vrot.slane %v695_v2, %v1016_v36  ;;  %s863_s7 = scalar_lea.vmem %s731_s4, 384  ;;  %p868_p1 = scmp.lt.s32.totalorder %s731_s4, %s731_s4 }
 0x6ae   :  { %v381_v5 = vpop.permute.xlu0 %380  ;;  %825 = vmatprep.subr.mxu0 %v887_v19  ;;  %p864_p0 = scmp.ne.s32.totalorder %s731_s4, %s863_s7  ;;  %p869_p2 = scmp.lt.s32.totalorder %s863_s7, %s863_s7 }
 0x6af   :  { %v377_v6 = vadd.f32 %v376_v4, %v372_v30  ;;  %826 = vmatpush3.msra.mxu0 %v402_v3  ;;  %v706_v3 = vsub.s32 1, %v1010_v34 }
 0x6b0   :  { %827 = vmatprep.subr.mxu0 %v887_v19  ;;  %p870_p3 = por %p869_p2, %p868_p1 }
 0x6b1   :  { %v378_v8 = vmax.f32 %v377_v6, 0.0  ;;  %v707_v30 = vrot.slane %v695_v2, %v706_v3  ;;  %v710_v6 = vsub.s32 2, %v1010_v34 }
 0x6b2   :  { %v384_v9 = vpop.permute.xlu0 %383  ;;  %p871_p4 = pnand %p870_p3, %p864_p0 }
 0x6b3   :  { %v389_v10 = vsel %vm46_vm0, %v378_v8, %v381_v5 }
 0x6b4   :  { %v390_v11 = vsel %vm48_vm1, %v389_v10, %v384_v9  ;;  %v711_v10 = vrot.slane %v695_v2, %v710_v6 }
 0x6b5   :  { %v392_v12 = vsel %vm391_vm8, %v390_v11, %v387_v7 }
 0x6b6   :  { %v394_v13 = vsel %vm393_vm9, %v392_v12, 1.0  ;;  %v400_v14 = vpop.permute.xlu0 %399 }
 0x6b7   :  { %828 = vmatpush3.msra.mxu0 %v400_v14  ;;  %v396_v16 = vsel %vm395_vm10, %v394_v13, 0.0 }
 0x6b8   :  { %829 = vmatprep.subr.mxu0 %v887_v19 }
 0x6b9   :  { %830 = vmatpush3.msra.mxu0 %v398_v15 }
 0x6ba   :  { %832 = vmatmul.mubr.msk.f32.vlgmr.msra.gmra.mxu0 %vm101_vm5, %v396_v16 }
 0x77a   :  { %v490_v17 = vpop.f32.mrf.mxu0 }
 0x77b   :  { %v496_v18 = vmul.f32 %v490_v17, %v490_v17 }
 0x77c   :  { %v833_v20 = vpop.f32.mrf.mxu0 }
 0x77d   :  { %498 = vrot.lane.b32.xlu0 %v496_v18, %s886_s0 }
 0x7ef   :  { %v499_v21 = vpop.permute.xlu0 %498 }
 0x7f0   :  { %v501_v22 = vsel %vm46_vm0, %v490_v17, %v499_v21 }
 0x7f1   :  { %v502_v23 = vsel %vm48_vm1, %v501_v22, 0.0 }
 0x7f2   :  { %v503_v31 = vrot.slane %v502_v23, 4 }
 0x7f4   :  { %v504_v33 = vadd.f32 %v503_v31, %v502_v23 }
 0x7f6   :  { %v505_v35 = vrot.slane %v504_v33, 2 }
 0x7f8   :  { %v506_v37 = vadd.f32 %v505_v35, %v504_v33 }
 0x7fa   :  { %v507_v38 = vrot.slane %v506_v37, 1 }
 0x7fc   :  { %v508_v39 = vadd.f32 %v507_v38, %v506_v37 }
 0x7fe   :  { %v509_v40 = vmul.f32 0.125, %v508_v39 }
 0x800   :  { %v510_v41 = vmul.f32 %v509_v40, %v509_v40 }
 0x802   :  { %512 = vrot.lane.b32.xlu1 %v510_v41, %s886_s0 }
 0x874   :  { %v513_v42 = vpop.permute.xlu1 %512 }
 0x875   :  { %v515_v43 = vsub.f32 %v509_v40, %v513_v42 }
 0x877   :  { %v516_v44 = vmax.f32 %v515_v43, 0.0 }
 0x879   :  { %v517_v45 = vadd.f32 1e-05, %v516_v44 }
 0x87b   :  { %861 = vrsqrt.f32 %v517_v45 }
 0x888   :  { %v862_v55 = vpop.eup %861 }
 0x889   :  { %520 = vrot.lane.b32.xlu0 %v862_v55, %s888_s13 }
 0x8fb   :  { %v521_v57 = vpop.permute.xlu0 %520 }
 0x8fc   :  { %v523_v25 = vmul.f32 %v521_v57, %v494_v56 }
 0x8fe   :  { %v524_v59 = vmul.f32 %v523_v25, %v509_v40  ;;  %v529_v60 = vrot.slane %v523_v25, %v1016_v36 }
 0x900   :  { %v525_v24 = vsub.f32 %v495_v58, %v524_v59  ;;  %v530_v61 = vmul.f32 %v529_v60, %v490_v17 }
 0x902   :  { %v534_v26 = vrot.slane %v525_v24, %v1016_v36 }
 0x904   :  { %v535_v0 = vadd.f32 %v534_v26, %v530_v61 }
 0x906   :  { %v536_v28 = vmax.f32 %v535_v0, 0.0 }
 0x908   :  { %v537_v29 = vsel %vm46_vm0, %v536_v28, 1.0 }
 0x909   :  { %v538_v62 = vsel %vm89_vm3, %v537_v29, 0.0 }
 0x90a   :  { %743 = vmatmul.mubr.msk.f32.vlgmr.msra.gmra.mxu1 %vm48_vm1, %v538_v62 }
 0x90b   :  { %835 = vmatpush3.msra.mxu1 %v550_v32  ;;  %842 = vmatprep.mubr.msk.f32.mxu1 %vm889_vm2, %v887_v19 }
 0x90c   :  { %836 = vmatprep.subr.mxu1 %v887_v19 }
 0x90d   :  { %837 = vmatpush3.msra.mxu1 %v547_v63 }
 0x90e   :  { %838 = vmatprep.subr.mxu1 %v887_v19 }
 0x90f   :  { %839 = vmatpush3.msra.mxu1 %v544_v27 }
 0x910   :  { %840 = vmatprep.subr.mxu1 %v887_v19 }
 0x911   :  { %841 = vmatpush3.msra.mxu1 %v541_v1 }
 0x912   :  { %843 = vmatmul.mubr.msk.f32.vlgmr.msra.gmra.mxu1 %vm48_vm1, %v538_v62 }
 0x9ca   :  { %v620_v4 = vpop.f32.mrf.mxu1 }
 0x9cb   :  { %vm696_vm11 = vcmp.lt.f32.partialorder %v620_v4, 0.0  ;;  %v715_v5 = vmul.f32 %v703_v47, %v620_v4 }
 0x9cc   :  { %v622_v7 = vpop.f32.mrf.mxu1 }
 0x9cd   :  { %v718_v8 = vsel %vm696_vm11, %v715_v5, %v620_v4  ;;  %vm697_vm12 = vcmp.lt.f32.partialorder %v622_v7, 0.0  ;;  %v716_v19 = vmul.f32 %v707_v30, %v622_v7 }
 0x9ce   :  { %721 = vst [vmem:[#allocation2] sm:$0xff] %v718_v8 }
 0x9cf   :  { %v719_v9 = vsel %vm697_vm12, %v716_v19, %v622_v7 }
 0x9d0   :  { %722 = vst [vmem:[#allocation2 + $0x8] sm:$0xff] %v719_v9 }
 0x9d2   :  { %v691_v11 = vpop.f32.mrf.mxu1 }
 0x9d3   :  { %vm698_vm13 = vcmp.lt.f32.partialorder %v691_v11, 0.0  ;;  %v717_v12 = vmul.f32 %v711_v10, %v691_v11 }
 0x9d4   :  { %v844_v36 = vpop.f32.mrf.mxu1 }
 0x9d5   :  { %v720_v13 = vsel %vm698_vm13, %v717_v12, %v691_v11 }
 0x9d6   :  { %723 = vst [vmem:[#allocation2 + $0x10] sm:$0xff] %v720_v13 }
 0x9d7   :  { %874 = shalt.err (!%p871_p4)
}
 0x9d8   :  { %733 = dma.vmem_to_hbm [thread:$0]  %s731_s4, 384, %s1192_s5, [#allocation3]  }
 0x9d9   :  { %883 = dma.done.wait [#allocation3], 384  }
 0x9da   :  { %884 = vsyncadd [#allocation3], 4294966912 }
 0x9db   :  { %737 = vsyncpa [#allocation3], 1 }

</bundles_post_ra>
